<compile_context>
chip_gen: v7x
topology: tpu7x:2x2x1
jax: 0.10.0
libtpu: 0.0.40
codegen_flags: <defaults>
</compile_context>

<pallas_src>
import jax
import jax.numpy as jnp
from jax.experimental import pallas as pl
from jax.experimental.pallas import tpu as pltpu

HIDDEN = 128
HALF = HIDDEN // 2              # 64
OUTPUT = 4
BRANCH_IN = 20                  # len(branch_columns)
TRUNK_IN = 1                    # len(trunk_columns)
BRANCH_OUT = OUTPUT * HIDDEN    # 512
PACK_OUT = BRANCH_OUT + HIDDEN  # 640 = fused fc5 output width
IN_COLS = 32                    # packed input width (20 branch + 1 trunk + pad)
OUT_LANES = HIDDEN              # lane-dense output block width (cols 0:4 useful)

# Packed weight buffer wa: shape (288, 256), all offsets sublane/lane aligned.
WA_ROWS = IN_COLS + 2 * HIDDEN          # 288
WA_COLS = 2 * HIDDEN                    # 256
WA_W1_R0 = 0                            # rows [0,32)  , cols [0,256): fused fc1
WA_W2_R0 = IN_COLS                      # rows [32,288), cols [0,128): block-diag fc2
WA_W3_R0 = IN_COLS                      # rows [32,160), cols [128,256): block-diag fc3
WA_W4_R0 = IN_COLS + HIDDEN             # rows [160,288), cols [128,256): block-diag fc4

# Packed bias buffer layout (lane aligned).
B1_OFF = 0                              # 256 wide: [branch b1 | trunk b1]
B2_OFF = 2 * HIDDEN                     # 128 wide
B3_OFF = 3 * HIDDEN                     # 128 wide
B4_OFF = 4 * HIDDEN                     # 128 wide
B5_OFF = 5 * HIDDEN                     # 640 wide
BIAS_COLS = B5_OFF + PACK_OUT           # 1280


def _softplus(x):
    # matches torch.nn.functional.softplus(beta=1, threshold=20)
    return jnp.where(x > 20.0, x, jnp.log1p(jnp.exp(jnp.minimum(x, 20.0))))


def deeponet_kernel(xin_ref, wa_ref, w5_ref, sel_ref, bias_ref, out_ref):
    """Whole DeepONet forward for one (TB, ...) batch tile."""
    f32 = jnp.float32
    wdt = wa_ref.dtype  # matmul-input dtype (f32 default, bf16 if packed so)

    x = xin_ref[...].astype(wdt)                                   # (TB, 32)

    # Static, aligned slices of the packed weight/bias buffers.
    w1 = wa_ref[WA_W1_R0:WA_W1_R0 + IN_COLS, :]                    # (32, 256)
    w2 = wa_ref[WA_W2_R0:WA_W2_R0 + 2 * HIDDEN, 0:HIDDEN]          # (256, 128)
    w3 = wa_ref[WA_W3_R0:WA_W3_R0 + HIDDEN, HIDDEN:2 * HIDDEN]     # (128, 128)
    w4 = wa_ref[WA_W4_R0:WA_W4_R0 + HIDDEN, HIDDEN:2 * HIDDEN]     # (128, 128)

    b1 = bias_ref[:, B1_OFF:B1_OFF + 2 * HIDDEN]                   # (1, 256)
    b2 = bias_ref[:, B2_OFF:B2_OFF + HIDDEN]
    b3 = bias_ref[:, B3_OFF:B3_OFF + HIDDEN]
    b4 = bias_ref[:, B4_OFF:B4_OFF + HIDDEN]
    b5 = bias_ref[:, B5_OFF:B5_OFF + PACK_OUT]                     # (1, 640)

    # Layer 1: branch and trunk fc1 fused into one (32 -> 256) matmul
    # (trunk weight lives in row 20, zero rows kill the input padding).
    h = jnp.tanh(jnp.dot(x, w1, preferred_element_type=f32) + b1)  # (TB, 256)

    # Layers 2-4: branch & trunk fused via block-diagonal weights.
    # Lane layout after layer 2: lanes [0:64] branch, [64:128] trunk.
    h = jnp.tanh(jnp.dot(h.astype(wdt), w2, preferred_element_type=f32) + b2)
    h = jnp.tanh(jnp.dot(h.astype(wdt), w3, preferred_element_type=f32) + b3)
    h = jnp.tanh(jnp.dot(h.astype(wdt), w4, preferred_element_type=f32) + b4)

    # Layer 5 (no activation): block-diagonal (128 -> 640).
    h5 = jnp.dot(h.astype(wdt), w5_ref[...], preferred_element_type=f32) + b5

    branch = h5[:, :BRANCH_OUT]                                    # (TB, 512)
    trunk = h5[:, BRANCH_OUT:]                                     # (TB, 128)

    # torch.bmm(branch.view(B,4,H), trunk.view(B,H,1)).squeeze(2) done without
    # relayout: lane-aligned broadcast-multiply + segment-sum on the MXU via a
    # 0/1 selector; output stays lane-dense (TB, 128), cols 0:4 are the result.
    prod = branch * jnp.concatenate([trunk, trunk, trunk, trunk], axis=-1)
    combined = jnp.dot(prod, sel_ref[...], preferred_element_type=f32)  # (TB, 128)

    tb = combined.shape[0]
    # delta_C (col 0) stays raw; qe/k2/Ct (cols 1:4) get softplus.  Cols >= 4
    # are zero and discarded by the wrapper.  One lane-dense store.
    col = jax.lax.broadcasted_iota(jnp.int32, (tb, OUT_LANES), 1)
    out_ref[...] = jnp.where(col == 0, combined, _softplus(combined))


# ----------------------------------------------------------------------------
# Parameter init (PyTorch nn.Linear default init) and host-side packing.
# ----------------------------------------------------------------------------

def _init_linear(key, fan_in, fan_out):
    kw, kb = jax.random.split(key)
    bound = 1.0 / float(fan_in) ** 0.5
    w = jax.random.uniform(kw, (fan_in, fan_out), jnp.float32, -bound, bound)
    b = jax.random.uniform(kb, (1, fan_out), jnp.float32, -bound, bound)
    return w, b


def init_deeponet_params(key):
    branch_dims = [(BRANCH_IN, HIDDEN), (HIDDEN, HALF), (HALF, HALF),
                   (HALF, HALF), (HALF, BRANCH_OUT)]
    trunk_dims = [(TRUNK_IN, HIDDEN), (HIDDEN, HALF), (HALF, HALF),
                  (HALF, HALF), (HALF, HIDDEN)]
    keys = jax.random.split(key, 10)
    branch = [_init_linear(k, fi, fo) for k, (fi, fo) in zip(keys[:5], branch_dims)]
    trunk = [_init_linear(k, fi, fo) for k, (fi, fo) in zip(keys[5:], trunk_dims)]
    # lambda_* parameters exist on the module but are unused in forward().
    return {"branch": branch, "trunk": trunk}


def _block_diag(a, b):
    ra, ca = a.shape
    rb, cb = b.shape
    m = jnp.zeros((ra + rb, ca + cb), jnp.float32)
    m = m.at[:ra, :ca].set(a)
    m = m.at[ra:, ca:].set(b)
    return m


def pack_deeponet_params(params, dtype=jnp.float32):
    """Pack 20 weight/bias tensors into 4 DMA-friendly buffers (done once).

    `dtype=jnp.bfloat16` is recommended on v6e/v7x (MXU-input dtype only;
    biases, accumulation, tanh and the selector matmul stay float32).
    """
    (bw1, bb1), (bw2, bb2), (bw3, bb3), (bw4, bb4), (bw5, bb5) = params["branch"]
    (tw1, tb1), (tw2, tb2), (tw3, tb3), (tw4, tb4), (tw5, tb5) = params["trunk"]

    wa = jnp.zeros((WA_ROWS, WA_COLS), jnp.float32)
    # fused fc1: branch (20,128) into cols 0:128, trunk (1,128) row 20 cols 128:256
    wa = wa.at[0:BRANCH_IN, 0:HIDDEN].set(bw1)
    wa = wa.at[BRANCH_IN:BRANCH_IN + TRUNK_IN, HIDDEN:2 * HIDDEN].set(tw1)
    wa = wa.at[WA_W2_R0:WA_W2_R0 + 2 * HIDDEN, 0:HIDDEN].set(_block_diag(bw2, tw2))
    wa = wa.at[WA_W3_R0:WA_W3_R0 + HIDDEN, HIDDEN:2 * HIDDEN].set(_block_diag(bw3, tw3))
    wa = wa.at[WA_W4_R0:WA_W4_R0 + HIDDEN, HIDDEN:2 * HIDDEN].set(_block_diag(bw4, tw4))

    w5 = _block_diag(bw5, tw5)                                      # (128, 640)

    # Segment selector for the final contraction (kept f32; 4 useful columns).
    seg = jnp.arange(BRANCH_OUT) // HIDDEN                          # (512,)
    sel = (seg[:, None] == jnp.arange(OUT_LANES)[None, :]).astype(jnp.float32)

    bias = jnp.zeros((1, BIAS_COLS), jnp.float32)
    bias = bias.at[:, B1_OFF:B1_OFF + 2 * HIDDEN].set(jnp.concatenate([bb1, tb1], -1))
    bias = bias.at[:, B2_OFF:B2_OFF + HIDDEN].set(jnp.concatenate([bb2, tb2], -1))
    bias = bias.at[:, B3_OFF:B3_OFF + HIDDEN].set(jnp.concatenate([bb3, tb3], -1))
    bias = bias.at[:, B4_OFF:B4_OFF + HIDDEN].set(jnp.concatenate([bb4, tb4], -1))
    bias = bias.at[:, B5_OFF:B5_OFF + PACK_OUT].set(jnp.concatenate([bb5, tb5], -1))
    return wa.astype(dtype), w5.astype(dtype), sel, bias


# ----------------------------------------------------------------------------
# Forward wrapper.
# ----------------------------------------------------------------------------

def _round_up(x, m):
    return (x + m - 1) // m * m


def deeponet_forward(branch_input, trunk_input, C0_values, packed, *, tile_b=512):
    # C0_values is accepted (PyTorch signature) but unused in forward().
    del C0_values
    wa, w5, sel, bias = packed

    B = branch_input.shape[0]
    # Batch tile: sublane aligned, capped at ceil(B/2) so the grid has >= 2
    # parallel steps whenever B allows it (keeps both v7x TensorCores busy;
    # neutral on v5e/v6e).
    half = _round_up(max((B + 1) // 2, 1), 8)
    TB = max(8, min(_round_up(tile_b, 8), half))
    Bp = _round_up(B, TB)

    # Host-pack branch/trunk inputs into one lane-padded (Bp, 32) buffer.
    xin = jnp.zeros((Bp, IN_COLS), jnp.float32)
    xin = xin.at[:B, 0:BRANCH_IN].set(branch_input.astype(jnp.float32))
    xin = xin.at[:B, BRANCH_IN:BRANCH_IN + TRUNK_IN].set(trunk_input.astype(jnp.float32))

    out = pl.pallas_call(
        deeponet_kernel,
        out_shape=jax.ShapeDtypeStruct((Bp, OUT_LANES), jnp.float32),
        grid_spec=pltpu.PrefetchScalarGridSpec(
            num_scalar_prefetch=0,
            grid=(Bp // TB,),
            in_specs=[
                pl.BlockSpec((TB, IN_COLS), lambda i: (i, 0)),
                # Weights/biases: full-array blocks, same block every step
                # (VMEM-resident across the batch grid, no re-DMA).
                pl.BlockSpec((WA_ROWS, WA_COLS), lambda i: (0, 0)),
                pl.BlockSpec((HIDDEN, PACK_OUT), lambda i: (0, 0)),
                pl.BlockSpec((BRANCH_OUT, OUT_LANES), lambda i: (0, 0)),
                pl.BlockSpec((1, BIAS_COLS), lambda i: (0, 0)),
            ],
            out_specs=pl.BlockSpec((TB, OUT_LANES), lambda i: (i, 0)),
        ),
        compiler_params=pltpu.CompilerParams(
            dimension_semantics=("parallel",)),
    )(xin, wa, w5, sel, bias)

    out = out[:B, :OUTPUT]
    return out[:, 0:1], out[:, 1:2], out[:, 2:3], out[:, 3:4]


# Pure-JAX reference (mirrors the PyTorch module exactly) for correctness check.
def reference_forward(branch_input, trunk_input, params):
    def mlp(x, layers):
        for i, (w, b) in enumerate(layers):
            x = jnp.dot(x, w) + b
            if i < len(layers) - 1:
                x = jnp.tanh(x)
        return x

    branch = mlp(branch_input, params["branch"])         # (B, 512)
    trunk = mlp(trunk_input, params["trunk"])            # (B, 128)
    B = branch_input.shape[0]
    combined = jnp.einsum("boh,bh->bo", branch.reshape(B, OUTPUT, HIDDEN), trunk)
    sp = _softplus(combined)
    return combined[:, 0:1], sp[:, 1:2], sp[:, 2:3], sp[:, 3:4]


if __name__ == "__main__":
    key = jax.random.PRNGKey(0)
    kp, kb, kt, kc = jax.random.split(key, 4)

    params = init_deeponet_params(kp)
    packed = pack_deeponet_params(params)   # float32 (use jnp.bfloat16 on v6e/v7x)

    B = 16  # small batch; exercises a 2-step parallel grid (TB = 8)
    branch_input = jax.random.normal(kb, (B, BRANCH_IN), jnp.float32)
    trunk_input = jax.random.normal(kt, (B, TRUNK_IN), jnp.float32)
    C0_values = jax.random.uniform(kc, (B, 1), jnp.float32)

    outs = deeponet_forward(branch_input, trunk_input, C0_values, packed)
    jax.block_until_ready(outs)
    delta_C, qe, k2, Ct = outs

    assert delta_C.shape == (B, 1) and qe.shape == (B, 1)
    assert k2.shape == (B, 1) and Ct.shape == (B, 1)
    # softplus outputs must be non-negative
    assert bool(jnp.all(qe >= 0)) and bool(jnp.all(k2 >= 0)) and bool(jnp.all(Ct >= 0))

    # Numerical check against the unfused pure-JAX reference.  Tolerance is
    # tight enough to catch any packing/layout regression (those are O(0.1+))
    # while allowing for default TPU matmul precision differences between the
    # Pallas dots and the XLA reference dots.
    refs = reference_forward(branch_input, trunk_input, params)
    for got, want in zip(outs, refs):
        assert bool(jnp.allclose(got, want, atol=2e-3, rtol=2e-3)), (
            float(jnp.max(jnp.abs(got - want))))

    print("KERNEL_OK")
</pallas_src>

<mosaic_0001>
module attributes {stable_mosaic.version = 11 : i64} {
  func.func @deeponet_kernel(%arg0: i32, %arg1: memref<8x32xf32, #tpu.memory_space<vmem>>, %arg2: memref<288x256xf32, #tpu.memory_space<vmem>>, %arg3: memref<128x640xf32, #tpu.memory_space<vmem>>, %arg4: memref<512x128xf32, #tpu.memory_space<vmem>>, %arg5: memref<1x1280xf32, #tpu.memory_space<vmem>>, %arg6: memref<8x128xf32, #tpu.memory_space<vmem>>) attributes {dimension_semantics = [#tpu.dimension_semantics<parallel>], iteration_bounds = array<i64: 2>, scalar_prefetch = 0 : i64, scratch_operands = 0 : i64, tpu.core_type = #tpu.core_type<tc>, window_params = [{transform_indices = @transform_0, window_bounds = array<i64: 8, 32>}, {pipeline_mode = #tpu.pipeline_mode<synchronous>, transform_indices = @transform_1, window_bounds = array<i64: 288, 256>}, {pipeline_mode = #tpu.pipeline_mode<synchronous>, transform_indices = @transform_2, window_bounds = array<i64: 128, 640>}, {pipeline_mode = #tpu.pipeline_mode<synchronous>, transform_indices = @transform_3, window_bounds = array<i64: 512, 128>}, {pipeline_mode = #tpu.pipeline_mode<synchronous>, transform_indices = @transform_4, window_bounds = array<i64: 1, 1280>}, {transform_indices = @transform_5, window_bounds = array<i64: 8, 128>}]} {
    %c0 = arith.constant 0 : index
    %c0_0 = arith.constant 0 : index
    %0 = vector.load %arg1[%c0, %c0_0] : memref<8x32xf32, #tpu.memory_space<vmem>>, vector<8x32xf32>
    %c0_1 = arith.constant 0 : index
    %c0_2 = arith.constant 0 : index
    %1 = vector.load %arg2[%c0_1, %c0_2] : memref<288x256xf32, #tpu.memory_space<vmem>>, vector<32x256xf32>
    %c32 = arith.constant 32 : index
    %c0_3 = arith.constant 0 : index
    %2 = vector.load %arg2[%c32, %c0_3] : memref<288x256xf32, #tpu.memory_space<vmem>>, vector<256x128xf32>
    %c32_4 = arith.constant 32 : index
    %c128 = arith.constant 128 : index
    %3 = vector.load %arg2[%c32_4, %c128] : memref<288x256xf32, #tpu.memory_space<vmem>>, vector<128x128xf32>
    %c160 = arith.constant 160 : index
    %c128_5 = arith.constant 128 : index
    %4 = vector.load %arg2[%c160, %c128_5] : memref<288x256xf32, #tpu.memory_space<vmem>>, vector<128x128xf32>
    %c0_6 = arith.constant 0 : index
    %c0_7 = arith.constant 0 : index
    %5 = vector.load %arg5[%c0_6, %c0_7] : memref<1x1280xf32, #tpu.memory_space<vmem>>, vector<1x256xf32>
    %c0_8 = arith.constant 0 : index
    %c256 = arith.constant 256 : index
    %6 = vector.load %arg5[%c0_8, %c256] : memref<1x1280xf32, #tpu.memory_space<vmem>>, vector<1x128xf32>
    %c0_9 = arith.constant 0 : index
    %c384 = arith.constant 384 : index
    %7 = vector.load %arg5[%c0_9, %c384] : memref<1x1280xf32, #tpu.memory_space<vmem>>, vector<1x128xf32>
    %c0_10 = arith.constant 0 : index
    %c512 = arith.constant 512 : index
    %8 = vector.load %arg5[%c0_10, %c512] : memref<1x1280xf32, #tpu.memory_space<vmem>>, vector<1x128xf32>
    %c0_11 = arith.constant 0 : index
    %c640 = arith.constant 640 : index
    %9 = vector.load %arg5[%c0_11, %c640] : memref<1x1280xf32, #tpu.memory_space<vmem>>, vector<1x640xf32>
    %cst = arith.constant dense<0.000000e+00> : vector<8x256xf32>
    %10 = tpu.matmul %0, %1, %cst {dimension_numbers = #tpu.dot_dimension_numbers<[1], [0], [0], [1], [0, 0, 1, 1], [], []>} : vector<8x32xf32>, vector<32x256xf32>, vector<8x256xf32> -> vector<8x256xf32>
    %11 = vector.broadcast %5 : vector<1x256xf32> to vector<8x256xf32>
    %12 = arith.addf %10, %11 : vector<8x256xf32>
    %13 = math.tanh %12 : vector<8x256xf32>
    %cst_12 = arith.constant dense<0.000000e+00> : vector<8x128xf32>
    %14 = tpu.matmul %13, %2, %cst_12 {dimension_numbers = #tpu.dot_dimension_numbers<[1], [0], [0], [1], [0, 0, 1, 1], [], []>} : vector<8x256xf32>, vector<256x128xf32>, vector<8x128xf32> -> vector<8x128xf32>
    %15 = vector.broadcast %6 : vector<1x128xf32> to vector<8x128xf32>
    %16 = arith.addf %14, %15 : vector<8x128xf32>
    %17 = math.tanh %16 : vector<8x128xf32>
    %cst_13 = arith.constant dense<0.000000e+00> : vector<8x128xf32>
    %18 = tpu.matmul %17, %3, %cst_13 {dimension_numbers = #tpu.dot_dimension_numbers<[1], [0], [0], [1], [0, 0, 1, 1], [], []>} : vector<8x128xf32>, vector<128x128xf32>, vector<8x128xf32> -> vector<8x128xf32>
    %19 = vector.broadcast %7 : vector<1x128xf32> to vector<8x128xf32>
    %20 = arith.addf %18, %19 : vector<8x128xf32>
    %21 = math.tanh %20 : vector<8x128xf32>
    %cst_14 = arith.constant dense<0.000000e+00> : vector<8x128xf32>
    %22 = tpu.matmul %21, %4, %cst_14 {dimension_numbers = #tpu.dot_dimension_numbers<[1], [0], [0], [1], [0, 0, 1, 1], [], []>} : vector<8x128xf32>, vector<128x128xf32>, vector<8x128xf32> -> vector<8x128xf32>
    %23 = vector.broadcast %8 : vector<1x128xf32> to vector<8x128xf32>
    %24 = arith.addf %22, %23 : vector<8x128xf32>
    %25 = math.tanh %24 : vector<8x128xf32>
    %c0_15 = arith.constant 0 : index
    %c0_16 = arith.constant 0 : index
    %26 = vector.load %arg3[%c0_15, %c0_16] : memref<128x640xf32, #tpu.memory_space<vmem>>, vector<128x640xf32>
    %cst_17 = arith.constant dense<0.000000e+00> : vector<8x640xf32>
    %27 = tpu.matmul %25, %26, %cst_17 {dimension_numbers = #tpu.dot_dimension_numbers<[1], [0], [0], [1], [0, 0, 1, 1], [], []>} : vector<8x128xf32>, vector<128x640xf32>, vector<8x640xf32> -> vector<8x640xf32>
    %28 = vector.broadcast %9 : vector<1x640xf32> to vector<8x640xf32>
    %29 = arith.addf %27, %28 : vector<8x640xf32>
    %30 = vector.extract_strided_slice %29 {offsets = [0, 0], sizes = [8, 512], strides = [1, 1]} : vector<8x640xf32> to vector<8x512xf32>
    %31 = vector.extract_strided_slice %29 {offsets = [0, 512], sizes = [8, 128], strides = [1, 1]} : vector<8x640xf32> to vector<8x128xf32>
    %32 = tpu.concatenate %31, %31, %31, %31 in 1 : vector<8x128xf32>, vector<8x128xf32>, vector<8x128xf32>, vector<8x128xf32> -> vector<8x512xf32>
    %33 = arith.mulf %30, %32 : vector<8x512xf32>
    %c0_18 = arith.constant 0 : index
    %c0_19 = arith.constant 0 : index
    %34 = vector.load %arg4[%c0_18, %c0_19] : memref<512x128xf32, #tpu.memory_space<vmem>>, vector<512x128xf32>
    %cst_20 = arith.constant dense<0.000000e+00> : vector<8x128xf32>
    %35 = tpu.matmul %33, %34, %cst_20 {dimension_numbers = #tpu.dot_dimension_numbers<[1], [0], [0], [1], [0, 0, 1, 1], [], []>} : vector<8x512xf32>, vector<512x128xf32>, vector<8x128xf32> -> vector<8x128xf32>
    %36 = tpu.iota {dimensions = array<i32: 1>} : vector<8x128xi32>
    %c0_i32 = arith.constant 0 : i32
    %37 = vector.broadcast %c0_i32 : i32 to vector<8x128xi32>
    %38 = arith.cmpi eq, %36, %37 : vector<8x128xi32>
    %cst_21 = arith.constant 2.000000e+01 : f32
    %39 = vector.broadcast %cst_21 : f32 to vector<8x128xf32>
    %40 = arith.cmpf ogt, %35, %39 : vector<8x128xf32>
    %cst_22 = arith.constant 2.000000e+01 : f32
    %41 = vector.broadcast %cst_22 : f32 to vector<8x128xf32>
    %42 = arith.minimumf %35, %41 : vector<8x128xf32>
    %43 = math.exp %42 : vector<8x128xf32>
    %44 = math.log1p %43 : vector<8x128xf32>
    %45 = arith.select %40, %35, %44 : vector<8x128xi1>, vector<8x128xf32>
    %46 = arith.select %38, %35, %45 : vector<8x128xi1>, vector<8x128xf32>
    %c0_23 = arith.constant 0 : index
    %c0_24 = arith.constant 0 : index
    %47 = vector.load %arg6[%c0_23, %c0_24] : memref<8x128xf32, #tpu.memory_space<vmem>>, vector<8x128xf32>
    tpu.vector_store %arg6[%c0_23, %c0_24], %46 {strides = array<i32>} : memref<8x128xf32, #tpu.memory_space<vmem>>, vector<8x128xf32>,
    return
  }
  func.func @transform_0(%arg0: i32) -> (i32, i32) {
    %c0_i32 = arith.constant 0 : i32
    %c0_i32_0 = arith.constant 0 : i32
    return %arg0, %c0_i32 : i32, i32
  }
  func.func @transform_1(%arg0: i32) -> (i32, i32) {
    %c0_i32 = arith.constant 0 : i32
    %c0_i32_0 = arith.constant 0 : i32
    %c0_i32_1 = arith.constant 0 : i32
    return %c0_i32, %c0_i32_0 : i32, i32
  }
  func.func @transform_2(%arg0: i32) -> (i32, i32) {
    %c0_i32 = arith.constant 0 : i32
    %c0_i32_0 = arith.constant 0 : i32
    %c0_i32_1 = arith.constant 0 : i32
    return %c0_i32, %c0_i32_0 : i32, i32
  }
  func.func @transform_3(%arg0: i32) -> (i32, i32) {
    %c0_i32 = arith.constant 0 : i32
    %c0_i32_0 = arith.constant 0 : i32
    %c0_i32_1 = arith.constant 0 : i32
    return %c0_i32, %c0_i32_0 : i32, i32
  }
  func.func @transform_4(%arg0: i32) -> (i32, i32) {
    %c0_i32 = arith.constant 0 : i32
    %c0_i32_0 = arith.constant 0 : i32
    %c0_i32_1 = arith.constant 0 : i32
    return %c0_i32, %c0_i32_0 : i32, i32
  }
  func.func @transform_5(%arg0: i32) -> (i32, i32) {
    %c0_i32 = arith.constant 0 : i32
    %c0_i32_0 = arith.constant 0 : i32
    return %arg0, %c0_i32 : i32, i32
  }
}

</mosaic_0001>

<bundles_post_ra>
// kernel: tpu_custom_call.1
= control target key start
LH: loop header
LB: loop body
LE: loop exit
PB: predicated region body
PF: predicated region fallthrough
CT: control target
= control target key end

     0   :  { %10 = vsyncpa [#allocation3], 0  ;;  %s2519_s0 = inlined_call_operand.hbm [shape: f32[16,32], index: 0, kind: input, shape index: {}]   ;;  %s2520_s1 = inlined_call_operand.hbm [shape: f32[288,256], index: 1, kind: input, shape index: {}]   ;;  %s2521_s2 = inlined_call_operand.hbm [shape: f32[128,640], index: 2, kind: input, shape index: {}]   ;;  %s2522_s3 = inlined_call_operand.hbm [shape: f32[512,128], index: 3, kind: input, shape index: {}]   ;;  %s2523_s4 = inlined_call_operand.vmem [shape: f32[1,1280], index: 4, kind: input, shape index: {}]   ;;  %s2524_s5 = inlined_call_operand.hbm [shape: f32[16,128], index: 5, kind: output, shape index: {}]  }
   0x1   :  { %12 = vsyncpa [#allocation3 + $0x1], 0 }
   0x2   :  { %13 = vsyncpa [#allocation6], 0 }
   0x3   :  { %14 = vsyncpa [#allocation9], 0 }
   0x4   :  { %15 = vsyncpa [#allocation4], 0 }
   0x5   :  { %17 = vsyncpa [#allocation4 + $0x1], 0  ;;  %s2196_s18 = smov 0   ;;  %s2198_s19 = smov 0  }
   0x6   :  { %s2200_s20 = smov 0   ;;  %s2202_s21 = smov 0  }
   0x7 LB: > { %s2217_s22 = sadd.s32 4294967295, %s2150_s21   ;;  %s1339_s23 = sadd.s32 4294967294, %s2150_s21   ;;  %s2150_s21 = sphi %s2202_s21, %s2547_s21   ;;  %s2146_s20 = sphi %s2200_s20, %s2546_s20   ;;  %s2142_s19 = sphi %s2198_s19, %s2545_s19   ;;  %s2138_s18 = sphi %s2196_s18, %s2544_s18  }
   0x8   : > { %p43_p0 = scmp.ne.s32.totalorder %s2142_s19, %s2138_s18  ;;  %p2525_p1 = scmp.eq.s32.totalorder %s2217_s22, 0 }
   0x9   : > { %p157_p3 = scmp.eq.s32.totalorder %s1339_s23, 1  ;;  %p1340_p5 = scmp.ge.s32.totalorder %s2150_s21, 1 }
   0xa   : > { %p2226_p4 = por %p2525_p1, %p43_p0  ;;  %p164_p7 = scmp.lt.s32.totalorder %s2150_s21, 3 }
   0xb   : > { %p2231_p6 = por %p157_p3, %p43_p0  ;;  %s2152_s27 = smov [#allocation5]  }
   0xc   : > { %s2528_s24 = scalar_select %p2226_p4, 1, 0 }
   0xd   : > { %s2529_s25 = scalar_select %p2231_p6, 1, 0 }
   0xe   : > { %p2236_p8 = pnand %p1340_p5, %p164_p7  ;;  %s176_s28 = sshll.u32 %s2152_s27, 4  ;;  %s2240_s28 = int_to_ptr.vmem [resolvable:$true] %s176_s28 }
   0xf   : > { %s2153_s30 = smov [#allocation7]   ;;  %s1962_s9 = scalar_lea.hbm %s2520_s1, 9216 }
  0x10   : > { %s2530_s26 = scalar_select %p2236_p8, 1, 0 }
  0x11   : > { %p1878_p9 = pneg %p2236_p8  ;;  %s189_s6 = sshll.u32 %s2153_s30, 4  ;;  %s2251_s6 = int_to_ptr.vmem [resolvable:$true] %s189_s6 }
  0x12   : > { %p1963_p12 = scmp.ne.s32.totalorder %s2520_s1, %s1962_s9  ;;  %p1969_p5 = scmp.lt.u32.totalorder %s1962_s9, %s2520_s1 }
  0x13   : > { %p2247_p11 = pnand %p1878_p9, %p2525_p1 }
  0x15   : > { %p2261_p13 = pneg %p2247_p11 }
  0x17   : > { %p1965_p0 = pnand %p2261_p13, %p1963_p12 }
  0x19   : > { %p1966_p3 = pneg %p1965_p0 }
  0x1b   : > { %p1971_p7 = pnand %p1969_p5, %p1966_p3 }
  0x1d   : > { %1974 = shalt.err (!%p1971_p7)
}
  0x1e   : > { %s1975_s15 = scalar_lea.vmem %s2240_s28, 9216  ;;  %p1983_p2 = scmp.lt.s32.totalorder %s2240_s28, %s2240_s28 }
  0x1f   : > { %p1976_p9 = scmp.ne.s32.totalorder %s2240_s28, %s1975_s15  ;;  %p1984_p6 = scmp.lt.s32.totalorder %s1975_s15, %s1975_s15 }
  0x21   : > { %p1978_p10 = pnand %p1976_p9, %p2261_p13  ;;  %p1985_p12 = por %p1984_p6, %p1983_p2 }
  0x23   : > { %p1979_p1 = pneg %p1978_p10 }
  0x25   : > { %p1986_p0 = pnand %p1985_p12, %p1979_p1 }
  0x27   : > { %1989 = shalt.err (!%p1986_p0)
}
  0x28   : > { %s2154_s16 = smov 256   ;;  %s2155_s17 = smov 16  }
  0x29   : > { %1881 = dma.hbm_to_vmem [thread:$0]  (!%p2247_p11), %s2520_s1, 9216, %s2240_s28, [#allocation6], %s2154_s16, %s2154_s16, %s2155_s17  }
  0x2a   : > { %s1990_s8 = scalar_lea.hbm %s2521_s2, 10240 }
  0x2b   : > { %p1991_p2 = scmp.ne.s32.totalorder %s2521_s2, %s1990_s8  ;;  %p1997_p10 = scmp.lt.u32.totalorder %s1990_s8, %s2521_s2 }
  0x2d   : > { %p1993_p1 = pnand %p1991_p2, %p2261_p13 }
  0x2f   : > { %p1994_p6 = pneg %p1993_p1 }
  0x31   : > { %p1999_p3 = pnand %p1997_p10, %p1994_p6 }
  0x33   : > { %2002 = shalt.err (!%p1999_p3)
}
  0x34   : > { %s2003_s28 = scalar_lea.vmem %s2251_s6, 10240  ;;  %p2011_p12 = scmp.lt.s32.totalorder %s2251_s6, %s2251_s6 }
  0x35   : > { %p2004_p5 = scmp.ne.s32.totalorder %s2251_s6, %s2003_s28  ;;  %p2012_p0 = scmp.lt.s32.totalorder %s2003_s28, %s2003_s28 }
  0x37   : > { %p2006_p7 = pnand %p2004_p5, %p2261_p13  ;;  %p2013_p2 = por %p2012_p0, %p2011_p12 }
  0x39   : > { %p2007_p9 = pneg %p2006_p7 }
  0x3b   : > { %p2014_p1 = pnand %p2013_p2, %p2007_p9 }
  0x3d   : > { %2017 = shalt.err (!%p2014_p1)
}
  0x3e   : > { %s2156_s14 = smov 640   ;;  %s2157_s15 = smov 40  }
  0x3f   : > { %1884 = dma.hbm_to_vmem [thread:$0]  (!%p2247_p11), %s2521_s2, 10240, %s2251_s6, [#allocation6], %s2156_s14, %s2156_s14, %s2157_s15  }
  0x40   : > { %s2158_s23 = smov [#allocation8]   ;;  %s2018_s8 = scalar_lea.hbm %s2522_s3, 8192 }
  0x41   : > { %s202_s27 = sshll.u32 %s2158_s23, 4  ;;  %p2019_p6 = scmp.ne.s32.totalorder %s2522_s3, %s2018_s8  ;;  %s203_s27 = int_to_ptr.vmem [resolvable:$true] %s202_s27 }
  0x42   : > { %p2025_p5 = scmp.lt.u32.totalorder %s2018_s8, %s2522_s3 }
  0x43   : > { %p2021_p10 = pnand %p2019_p6, %p2261_p13 }
  0x45   : > { %p2022_p3 = pneg %p2021_p10 }
  0x47   : > { %p2027_p7 = pnand %p2025_p5, %p2022_p3 }
  0x49   : > { %2030 = shalt.err (!%p2027_p7)
}
  0x4a   : > { %s2031_s6 = scalar_lea.vmem %s203_s27, 8192  ;;  %p2039_p2 = scmp.lt.s32.totalorder %s203_s27, %s203_s27 }
  0x4b   : > { %p2032_p9 = scmp.ne.s32.totalorder %s203_s27, %s2031_s6  ;;  %p2040_p1 = scmp.lt.s32.totalorder %s2031_s6, %s2031_s6 }
  0x4d   : > { %p2034_p12 = pnand %p2032_p9, %p2261_p13  ;;  %p2041_p4 = por %p2040_p1, %p2039_p2 }
  0x4f   : > { %p2035_p0 = pneg %p2034_p12 }
  0x51   : > { %p2042_p8 = pnand %p2041_p4, %p2035_p0 }
  0x53   : > { %2045 = shalt.err (!%p2042_p8)
}
  0x54   : > { %s2159_s28 = smov 128   ;;  %s2160_s12 = smov 8  }
  0x55   : > { %1887 = dma.hbm_to_vmem [thread:$0]  (!%p2247_p11), %s2522_s3, 8192, %s203_s27, [#allocation9], %s2159_s28, %s2159_s28, %s2160_s12  }
  0x56   : > { %s2324_s16 = sadd.s32 1, %s2150_s21   ;;  %s30_s23 = sadd.s32 1, %s2146_s20 }
  0x57   : > { %s27_s17 = ssub.s32 %s2150_s21, %s2324_s16  ;;  %p37_p8 = scmp.ne.s32.totalorder %s2146_s20, %s2142_s19 }
  0x58   : > { %p28_p4 = scmp.eq.s32.totalorder %s27_s17, 0  ;;  %p38_p13 = scmp.eq.s32.totalorder %s2150_s21, 0 }
  0x59   : > { %p1899_p6 = scmp.lt.s32.totalorder %s2150_s21, 2  ;;  %p2533_p3 = scmp.eq.s32.totalorder %s2217_s22, 1 }
  0x5a   : > { %s2334_s30 = scalar_select %p28_p4, %s2146_s20, %s30_s23  }
  0x5b   : > { %p39_p10 = por %p38_p13, %p37_p8  ;;  %p2338_p5 = por %p2533_p3, %p37_p8 }
  0x5c   : > { %s219_s29 = sand.u32 1, %s2146_s20   ;;  %s1346_s8 = sshll.u32 %s2150_s21, 7 }
  0x5d   : > { %s1345_s27 = sshll.u32 %s219_s29, 3  ;;  %s2347_s11 = scalar_lea.hbm %s2519_s0, %s1346_s8 }
  0x5e   : > { %s223_s13 = scalar_lea.vmem [#allocation2], %s1345_s27  ;;  %p2349_p11 = pnand %p1899_p6, %p39_p10 }
  0x5f   : > { %s230_s6 = sshll.u32 %s223_s13, 4  ;;  %s220_s12 = scalar_lea.sflag [#allocation3], %s219_s29  ;;  %s2353_s6 = int_to_ptr.vmem [resolvable:$true] %s230_s6 }
  0x60   : > { %s2046_s14 = scalar_lea.hbm %s2347_s11, 128  ;;  %p2048_p9 = pneg %p2349_p11 }
  0x61   : > { %p2047_p7 = scmp.ne.s32.totalorder %s2347_s11, %s2046_s14  ;;  %s2051_s23 = scalar_lea.hbm %s2519_s0, 256 }
  0x62   : > { %p2052_p2 = scmp.lt.u32.totalorder %s2347_s11, %s2519_s0  ;;  %p2053_p1 = scmp.lt.u32.totalorder %s2051_s23, %s2046_s14 }
  0x63   : > { %p2049_p12 = pnand %p2048_p9, %p2047_p7  ;;  %p2055_p8 = scmp.lt.u32.totalorder %s2046_s14, %s2347_s11 }
  0x64   : > { %p2054_p4 = por %p2053_p1, %p2052_p2 }
  0x65   : > { %p2050_p0 = pneg %p2049_p12 }
  0x66   : > { %p2056_p13 = por %p2055_p8, %p2054_p4 }
  0x68   : > { %p2057_p6 = pnand %p2056_p13, %p2050_p0 }
  0x6a   : > { %2060 = shalt.err (!%p2057_p6)
}
  0x6b   : > { %s2061_s29 = scalar_lea.vmem %s2353_s6, 128  ;;  %s2161_s9 = smov [#allocation2]  }
  0x6c   : > { %p2062_p10 = scmp.ne.s32.totalorder %s2353_s6, %s2061_s29  ;;  %s2066_s10 = sshll.u32 %s2161_s9, 4  ;;  %s2067_s10 = int_to_ptr.vmem [resolvable:$false] %s2066_s10 }
  0x6d   : > { %s2068_s13 = scalar_lea.vmem %s2067_s10, 256  ;;  %p2069_p12 = scmp.lt.s32.totalorder %s2353_s6, %s2067_s10 }
  0x6e   : > { %p2064_p3 = pnand %p2062_p10, %p2048_p9  ;;  %p2070_p2 = scmp.lt.s32.totalorder %s2068_s13, %s2061_s29 }
  0x70   : > { %p2065_p7 = pneg %p2064_p3  ;;  %p2071_p1 = por %p2070_p2, %p2069_p12 }
  0x72   : > { %p2072_p4 = pnand %p2071_p1, %p2065_p7 }
  0x74   : > { %2075 = shalt.err (!%p2072_p4)
}
  0x75   : > { %1891 = dma.hbm_to_vmem [thread:$0]  (!%p2349_p11), %s2347_s11, 128, %s2353_s6, %s220_s12  }
  0x76   : > { %p2536_p0 = scmp.ne.s32.totalorder %s2530_s26, 0 }
  0x77   : > { %s2383_s14 = sand.u32 (!%p2536_p0), 1, %s2142_s19   ;;  %p2537_p9 = scmp.ne.s32.totalorder (!%p2536_p0), %s2528_s24, 0 }
  0x78   : > { %239 = sbr.rel (%p2536_p0) target bundleno = 1564 (0x61c), region = 40  ;;  %s1348_s15 = sshll.u32 (!%p2536_p0), %s2383_s14, 3 }
  0x79   : > { %s242_s17 = scalar_lea.sflag (!%p2536_p0), [#allocation3], %s2383_s14  ;;  %s2389_s23 = scalar_lea.vmem (!%p2536_p0), [#allocation2], %s1348_s15 }
  0x7f   : > { %2121 = dma.done.wait (%p2537_p9), %s242_s17, 128  }
  0x80   : > { %2123 = vsyncadd (%p2537_p9), %s242_s17, 4294967168  ;;  %p2538_p11 = scmp.eq.s32.totalorder %s2217_s22, 0 }
  0x82   : > { %2125 = dma.done.wait (%p2538_p11), [#allocation6], 19456   ;;  %p2539_p8 = pmov %p2538_p11 }
  0x84   : > { %2127 = vsyncadd (%p2539_p8), [#allocation6], 4294947840  ;;  %p2540_p13 = pmov %p2539_p8 }
  0x85   : > { %p2541_p6 = pmov %p2539_p8 }
  0x86   : > { %2129 = dma.done.wait (%p2540_p13), [#allocation9], 8192  }
  0x87   : > { %2131 = vsyncadd (%p2541_p6), [#allocation9], 4294959104  ;;  %v2162_v0 = vmov 0.0   ;;  %v286_v1 = vld [vmem:[#allocation5 + $0x8] sm:$0xff]  ;;  %v288_v2 = vld [vmem:[#allocation5 + $0x18] sm:$0xff]  ;;  %vm373_vm0 = vcmask 261120  }
  0x88   : > { %441 = vmatprep.mubr.f32.mxu0 %v2162_v0  ;;  %v285_v3 = vld [vmem:[#allocation5] sm:$0xff]  ;;  %v1622_v4 = vpack.c.bf16 %v288_v2, %v286_v1  ;;  %v287_v5 = vld [vmem:[#allocation5 + $0x10] sm:$0xff]  ;;  %v290_v6 = vld [vmem:[#allocation5 + $0x28] sm:$0xff]  ;;  %v2163_v2 = vmov 0.0|0.0   ;;  %vm2164_vm1 = vmmov 0   ;;  %s1358_s10 = sshll.u32 %s2217_s22, 7 }
  0x89   : > { %v292_v7 = vld [vmem:[#allocation5 + $0x38] sm:$0xff]  ;;  %v1624_v8 = vpack.c.bf16 %v287_v5, %v285_v3  ;;  %v289_v10 = vld [vmem:[#allocation5 + $0x20] sm:$0xff]  ;;  %v291_v11 = vld [vmem:[#allocation5 + $0x30] sm:$0xff]  ;;  %s283_s13 = scalar_lea.vmem [#allocation10], %s1348_s15  ;;  %s2475_s26 = scalar_lea.hbm %s2524_s5, %s1358_s10 }
  0x8a   : > { %v1626_v9 = vpack.c.bf16 %v292_v7, %v290_v6  ;;  %1623 = vmatprep.subr.bf16.mxu0 %v1622_v4  ;;  %v309_v12 = vld [vmem:[#allocation5 + $0x140] sm:$0xff]  ;;  %v310_v13 = vld [vmem:[#allocation5 + $0x150] sm:$0xff]  ;;  %v1628_v15 = vpack.c.bf16 %v291_v11, %v289_v10  ;;  %v325_v62 = vld [vmem:[#allocation5 + $0x48] sm:$0xff]  ;;  %s1240_s17 = sshll.u32 %s283_s13, 4  ;;  %s1227_s22 = scalar_lea.sflag [#allocation4], %s2383_s14  ;;  %s2477_s17 = int_to_ptr.vmem [resolvable:$true] %s1240_s17 }
  0x8b   : > { %v293_v14 = vld [vmem:[#allocation5 + $0x40] sm:$0xff]  ;;  %1625 = vmatpush1.bf16.msra.mxu0 %v1624_v8  ;;  %v1630_v16 = vpack.c.bf16 %v310_v13, %v309_v12  ;;  %v294_v17 = vld [vmem:[#allocation5 + $0x50] sm:$0xff]  ;;  %v326_v63 = vld [vmem:[#allocation5 + $0x58] sm:$0xff]  ;;  %v363_v12 = vlaneseq  ;;  %s2076_s15 = scalar_lea.vmem %s2477_s17, 128  ;;  %s2165_s11 = smov [#allocation10]  }
  0x8c   : > { %v311_v18 = vld [vmem:[#allocation5 + $0x160] sm:$0xff]  ;;  %v312_v19 = vld [vmem:[#allocation5 + $0x170] sm:$0xff]  ;;  %1627 = vmatprep.subr.bf16.mxu0 %v1626_v9  ;;  %v1632_v20 = vpack.c.bf16 %v294_v17, %v293_v14  ;;  %v327_v1 = vld [vmem:[#allocation5 + $0x68] sm:$0xff]  ;;  %v1663_v3 = vpack.c.bf16 %v326_v63, %v325_v62  ;;  %p2077_p10 = scmp.ne.s32.totalorder %s2477_s17, %s2076_s15  ;;  %s2080_s6 = sshll.u32 %s2165_s11, 4  ;;  %s2081_s6 = int_to_ptr.vmem [resolvable:$false] %s2080_s6 }
  0x8d   : > { %v1634_v21 = vpack.c.bf16 %v312_v19, %v311_v18  ;;  %v295_v22 = vld [vmem:[#allocation5 + $0x60] sm:$0xff]  ;;  %v296_v23 = vld [vmem:[#allocation5 + $0x70] sm:$0xff]  ;;  %1631 = vmatprep.subr.bf16.mxu1 %v1630_v16  ;;  %v328_v4 = vld [vmem:[#allocation5 + $0x78] sm:$0xff]  ;;  %v2412_v13 = vshrl.u32 %v363_v12, 7  ;;  %s2082_s28 = scalar_lea.vmem %s2081_s6, 256  ;;  %p2083_p12 = scmp.lt.s32.totalorder %s2477_s17, %s2081_s6 }
  0x8e   : > { %v313_v24 = vld [vmem:[#allocation5 + $0x180] sm:$0xff]  ;;  %v314_v25 = vld [vmem:[#allocation5 + $0x190] sm:$0xff]  ;;  %1633 = vmatpush3.bf16.msra.mxu1 %v1632_v20  ;;  %v1636_v26 = vpack.c.bf16 %v296_v23, %v295_v22  ;;  %v1666_v5 = vpack.c.bf16 %v328_v4, %v327_v1  ;;  %v329_v6 = vld [vmem:[#allocation5 + $0x88] sm:$0xff]  ;;  %p2078_p3 = pnand %p2077_p10, %p2338_p5  ;;  %p2084_p2 = scmp.lt.s32.totalorder %s2082_s28, %s2076_s15 }
  0x8f   : > { %1629 = vmatpush1.bf16.msra.mxu0 %v1628_v15  ;;  %v284_v27 = vld [vmem:[%s2389_s23] sm:$0xff]  ;;  %1635 = vmatprep.subr.bf16.mxu1 %v1634_v21  ;;  %v1638_v28 = vpack.c.bf16 %v314_v25, %v313_v24  ;;  %v297_v29 = vld [vmem:[#allocation5 + $0x80] sm:$0xff]  ;;  %v331_v9 = vld [vmem:[#allocation5 + $0xa8] sm:$0xff]  ;;  %v365_v14 = vsub.s32 0, %v2412_v13  ;;  %v369_v16 = vsub.s32 1, %v2412_v13 }
  0x90   : > { %v298_v30 = vld [vmem:[#allocation5 + $0x90] sm:$0xff]  ;;  %v315_v31 = vld [vmem:[#allocation5 + $0x1a0] sm:$0xff]  ;;  %1662 = vmatprep.subr.bf16.mxu0 %v2163_v2  ;;  %v330_v7 = vld [vmem:[#allocation5 + $0x98] sm:$0xff]  ;;  %p2079_p7 = pneg %p2078_p3  ;;  %p2085_p1 = por %p2084_p2, %p2083_p12 }
  0x91   : > { %v316_v32 = vld [vmem:[#allocation5 + $0x1b0] sm:$0xff]  ;;  %v1640_v33 = vpack.c.bf16 %v298_v30, %v297_v29  ;;  %v299_v35 = vld [vmem:[#allocation5 + $0xa0] sm:$0xff]  ;;  %v1669_v8 = vpack.c.bf16 %v330_v7, %v329_v6  ;;  %v332_v10 = vld [vmem:[#allocation5 + $0xb8] sm:$0xff] }
  0x92   : > { %1353 = vmatmul.mubr.msk.f32.vlgmr.msra.gmra.mrb[0].mxu0 %vm373_vm0, %v284_v27  ;;  %1637 = vmatpush3.bf16.msra.mxu1 %v1636_v26  ;;  %v1642_v34 = vpack.c.bf16 %v316_v32, %v315_v31  ;;  %v300_v36 = vld [vmem:[#allocation5 + $0xb0] sm:$0xff]  ;;  %v317_v38 = vld [vmem:[#allocation5 + $0x1c0] sm:$0xff]  ;;  %v1672_v11 = vpack.c.bf16 %v332_v10, %v331_v9  ;;  %v333_v25 = vld [vmem:[#allocation5 + $0xc8] sm:$0xff]  ;;  %p2086_p4 = pnand %p2085_p1, %p2079_p7 }
  0x93   : > { %1639 = vmatprep.subr.bf16.mxu1 %v1638_v28  ;;  %v1644_v37 = vpack.c.bf16 %v300_v36, %v299_v35  ;;  %v318_v39 = vld [vmem:[#allocation5 + $0x1d0] sm:$0xff]  ;;  %v301_v41 = vld [vmem:[#allocation5 + $0xc0] sm:$0xff]  ;;  %1664 = vmatpush3.bf16.msra.mxu0 %v1663_v3  ;;  %v334_v26 = vld [vmem:[#allocation5 + $0xd8] sm:$0xff] }
  0x94   : > { %v1646_v40 = vpack.c.bf16 %v318_v39, %v317_v38  ;;  %v302_v42 = vld [vmem:[#allocation5 + $0xd0] sm:$0xff]  ;;  %v319_v44 = vld [vmem:[#allocation5 + $0x1e0] sm:$0xff]  ;;  %1665 = vmatprep.subr.bf16.mxu0 %v2163_v2  ;;  %v1675_v27 = vpack.c.bf16 %v334_v26, %v333_v25  ;;  %v335_v28 = vld [vmem:[#allocation5 + $0xe8] sm:$0xff]  ;;  %1549 = vmatprep.mubr.msk.f32.mxu0 %vm2164_vm1, %v2162_v0 }
  0x95   : > { %v1648_v43 = vpack.c.bf16 %v302_v42, %v301_v41  ;;  %v320_v45 = vld [vmem:[#allocation5 + $0x1f0] sm:$0xff]  ;;  %v303_v47 = vld [vmem:[#allocation5 + $0xe0] sm:$0xff]  ;;  %v336_v29 = vld [vmem:[#allocation5 + $0xf8] sm:$0xff] }
  0x96   : > { %1641 = vmatpush3.bf16.msra.mxu1 %v1640_v33  ;;  %v1650_v46 = vpack.c.bf16 %v320_v45, %v319_v44  ;;  %v304_v48 = vld [vmem:[#allocation5 + $0xf0] sm:$0xff]  ;;  %v321_v50 = vld [vmem:[#allocation5 + $0x200] sm:$0xff]  ;;  %v1678_v30 = vpack.c.bf16 %v336_v29, %v335_v28  ;;  %v337_v31 = vld [vmem:[#allocation5 + $0x108] sm:$0xff] }
  0x97   : > { %1643 = vmatprep.subr.bf16.mxu1 %v1642_v34  ;;  %v1652_v49 = vpack.c.bf16 %v304_v48, %v303_v47  ;;  %v322_v51 = vld [vmem:[#allocation5 + $0x210] sm:$0xff]  ;;  %v305_v52 = vld [vmem:[#allocation5 + $0x100] sm:$0xff]  ;;  %1667 = vmatpush3.bf16.msra.mxu0 %v1666_v5  ;;  %v338_v32 = vld [vmem:[#allocation5 + $0x118] sm:$0xff] }
  0x98   : > { %v1654_v53 = vpack.c.bf16 %v322_v51, %v321_v50  ;;  %v306_v54 = vld [vmem:[#allocation5 + $0x110] sm:$0xff]  ;;  %v323_v55 = vld [vmem:[#allocation5 + $0x220] sm:$0xff]  ;;  %1668 = vmatprep.subr.bf16.mxu0 %v2163_v2  ;;  %v1681_v33 = vpack.c.bf16 %v338_v32, %v337_v31  ;;  %v339_v34 = vld [vmem:[#allocation5 + $0x128] sm:$0xff] }
  0x99   : > { %v324_v56 = vld [vmem:[#allocation5 + $0x230] sm:$0xff]  ;;  %v1656_v57 = vpack.c.bf16 %v306_v54, %v305_v52  ;;  %v307_v59 = vld [vmem:[#allocation5 + $0x120] sm:$0xff]  ;;  %v340_v35 = vld [vmem:[#allocation5 + $0x138] sm:$0xff] }
  0x9a   : > { %1645 = vmatpush3.bf16.msra.mxu1 %v1644_v37  ;;  %v1658_v58 = vpack.c.bf16 %v324_v56, %v323_v55  ;;  %v308_v60 = vld [vmem:[#allocation5 + $0x130] sm:$0xff]  ;;  %v1684_v36 = vpack.c.bf16 %v340_v35, %v339_v34  ;;  %v341_v37 = vld [vmem:[#allocation5 + $0x148] sm:$0xff]  ;;  %v342_v38 = vld [vmem:[#allocation5 + $0x158] sm:$0xff] }
  0x9b   : > { %1647 = vmatprep.subr.bf16.mxu1 %v1646_v40  ;;  %v1660_v61 = vpack.c.bf16 %v308_v60, %v307_v59  ;;  %1670 = vmatpush3.bf16.msra.mxu0 %v1669_v8  ;;  %v357_v15 = vld [vmem:[%s2523_s4] sm:$0x3]  ;;  %v343_v39 = vld [vmem:[#allocation5 + $0x168] sm:$0xff]  ;;  %v1687_v40 = vpack.c.bf16 %v342_v38, %v341_v37  ;;  %v344_v41 = vld [vmem:[#allocation5 + $0x178] sm:$0xff] }
  0x9c   : > { %1671 = vmatprep.subr.bf16.mxu0 %v2163_v2  ;;  %v366_v17 = vrot.slane %v357_v15, %v365_v14  ;;  %v370_v18 = vrot.slane %v357_v15, %v369_v16  ;;  %v1690_v42 = vpack.c.bf16 %v344_v41, %v343_v39  ;;  %v346_v44 = vld [vmem:[#allocation5 + $0x198] sm:$0xff]  ;;  %v355_v1 = vld [vmem:[#allocation5 + $0x228] sm:$0xff]  ;;  %v687_v6 = vld [vmem:[#allocation7 + $0x30] sm:$0xff] }
  0x9d   : > { %v348_v47 = vld [vmem:[#allocation5 + $0x1b8] sm:$0xff]  ;;  %v682_v5 = vld [vmem:[#allocation7 + $0x8] sm:$0xff]  ;;  %v681_v7 = vld [vmem:[#allocation7] sm:$0xff] }
  0x9e   : > { %1649 = vmatpush3.bf16.msra.mxu1 %v1648_v43  ;;  %v345_v43 = vld [vmem:[#allocation5 + $0x188] sm:$0xff]  ;;  %v350_v50 = vld [vmem:[#allocation5 + $0x1d8] sm:$0xff]  ;;  %v1710_v8 = vpack.c.bf16 %v687_v6, %v682_v5  ;;  %v707_v25 = vld [vmem:[#allocation7 + $0xd0] sm:$0xff] }
  0x9f   : > { %1651 = vmatprep.subr.bf16.mxu1 %v1650_v46  ;;  %1673 = vmatpush3.bf16.msra.mxu0 %v1672_v11  ;;  %v1693_v45 = vpack.c.bf16 %v346_v44, %v345_v43  ;;  %v347_v46 = vld [vmem:[#allocation5 + $0x1a8] sm:$0xff]  ;;  %v352_v59 = vld [vmem:[#allocation5 + $0x1f8] sm:$0xff]  ;;  %v689_v11 = vld [vmem:[#allocation7 + $0x40] sm:$0xff] }
  0xa0   : > { %1674 = vmatprep.subr.bf16.mxu0 %v2163_v2  ;;  %v1696_v48 = vpack.c.bf16 %v348_v47, %v347_v46  ;;  %v354_v62 = vld [vmem:[#allocation5 + $0x218] sm:$0xff]  ;;  %v686_v9 = vld [vmem:[#allocation7 + $0x28] sm:$0xff]  ;;  %v717_v31 = vld [vmem:[#allocation7 + $0x120] sm:$0xff] }
  0xa1   : > { %v356_v3 = vld [vmem:[#allocation5 + $0x238] sm:$0xff]  ;;  %v1712_v15 = vpack.c.bf16 %v686_v9, %v681_v7  ;;  %v706_v28 = vld [vmem:[#allocation7 + $0xc8] sm:$0xff]  ;;  %v711_v32 = vld [vmem:[#allocation7 + $0xf0] sm:$0xff] }
  0xa2   : > { %1653 = vmatpush3.bf16.msra.mxu1 %v1652_v49  ;;  %v349_v49 = vld [vmem:[#allocation5 + $0x1c8] sm:$0xff]  ;;  %v1708_v4 = vpack.c.bf16 %v356_v3, %v355_v1  ;;  %v684_v10 = vld [vmem:[#allocation7 + $0x18] sm:$0xff]  ;;  %v727_v37 = vld [vmem:[#allocation7 + $0x170] sm:$0xff] }
  0xa3   : > { %1655 = vmatprep.subr.bf16.mxu1 %v1654_v53  ;;  %1676 = vmatpush3.bf16.msra.mxu0 %v1675_v27  ;;  %v1699_v51 = vpack.c.bf16 %v350_v50, %v349_v49  ;;  %v1354_v53 = vld [vmem:[%s2523_s4 + $0x2] ss:$0 sm:$0xff]  ;;  %v701_v27 = vld [vmem:[#allocation7 + $0xa0] sm:$0xff]  ;;  %v716_v34 = vld [vmem:[#allocation7 + $0x118] sm:$0xff] }
  0xa4   : > { %1677 = vmatprep.subr.bf16.mxu0 %v2163_v2  ;;  %v1720_v29 = vpack.c.bf16 %v706_v28, %v701_v27  ;;  %v1724_v35 = vpack.c.bf16 %v716_v34, %v711_v32  ;;  %v721_v38 = vld [vmem:[#allocation7 + $0x140] sm:$0xff]  ;;  %v683_v46 = vld [vmem:[#allocation7 + $0x10] sm:$0xff]  ;;  %v688_v47 = vld [vmem:[#allocation7 + $0x38] sm:$0xff] }
  0xa5   : > { %v699_v49 = vld [vmem:[#allocation7 + $0x90] sm:$0xff]  ;;  %v1744_v50 = vpack.c.bf16 %v688_v47, %v683_v46  ;;  %v713_v3 = vld [vmem:[#allocation7 + $0x100] sm:$0xff]  ;;  %v724_v5 = vld [vmem:[#allocation7 + $0x158] sm:$0xff] }
  0xa6   : > { %1657 = vmatpush3.bf16.msra.mxu1 %v1656_v57  ;;  %v729_v6 = vld [vmem:[#allocation7 + $0x180] sm:$0xff]  ;;  %v723_v9 = vld [vmem:[#allocation7 + $0x150] sm:$0xff]  ;;  %v742_v28 = vld [vmem:[#allocation7 + $0x1e8] sm:$0xff] }
  0xa7   : > { %1659 = vmatprep.subr.bf16.mxu1 %v1658_v58  ;;  %1679 = vmatpush3.bf16.msra.mxu0 %v1678_v30  ;;  %v351_v58 = vld [vmem:[#allocation5 + $0x1e8] sm:$0xff]  ;;  %v712_v30 = vld [vmem:[#allocation7 + $0xf8] sm:$0xff]  ;;  %v759_v46 = vld [vmem:[#allocation7 + $0x270] sm:$0xff] }
  0xa8   : > { %1680 = vmatprep.subr.bf16.mxu0 %v2163_v2  ;;  %v1702_v60 = vpack.c.bf16 %v352_v59, %v351_v58  ;;  %v703_v59 = vld [vmem:[#allocation7 + $0xb0] sm:$0xff]  ;;  %v746_v32 = vld [vmem:[#allocation7 + $0x208] sm:$0xff] }
  0xaa   : > { %1661 = vmatpush3.bf16.msra.mxu1 %v1660_v61  ;;  %v353_v61 = vld [vmem:[#allocation5 + $0x208] sm:$0xff] }
  0xab   : > { %1686 = vmatprep.subr.bf16.mxu1 %v2163_v2  ;;  %1682 = vmatpush3.bf16.msra.mxu0 %v1681_v33  ;;  %v1705_v63 = vpack.c.bf16 %v354_v62, %v353_v61  ;;  %v1722_v33 = vpack.c.bf16 %v717_v31, %v712_v30  ;;  %v714_v61 = vld [vmem:[#allocation7 + $0x108] sm:$0xff]  ;;  %v719_v62 = vld [vmem:[#allocation7 + $0x130] sm:$0xff]  ;;  %v741_v31 = vld [vmem:[#allocation7 + $0x1e0] sm:$0xff] }
  0xac   : > { %1683 = vmatprep.subr.bf16.mxu0 %v2163_v2  ;;  %v1754_v1 = vpack.c.bf16 %v719_v62, %v714_v61  ;;  %v1736_v34 = vpack.c.bf16 %v746_v32, %v741_v31  ;;  %v1035_v31 = vld [vmem:[#allocation8 + $0x100] sm:$0xff]  ;;  %v1036_v32 = vld [vmem:[#allocation8 + $0x108] sm:$0xff] }
  0xaf   : > { %1685 = vmatpush3.bf16.msra.mxu0 %v1684_v36  ;;  %v722_v36 = vld [vmem:[#allocation7 + $0x148] sm:$0xff] }
  0xb0   : > { %1711 = vmatprep.subr.bf16.mxu0 %v1710_v8  ;;  %v1726_v39 = vpack.c.bf16 %v727_v37, %v722_v36  ;;  %v1758_v8 = vpack.c.bf16 %v729_v6, %v724_v5  ;;  %v743_v36 = vld [vmem:[#allocation7 + $0x1f0] sm:$0xff]  ;;  %v748_v37 = vld [vmem:[#allocation7 + $0x218] sm:$0xff] }
  0xb1   : > { %v720_v5 = vld [vmem:[#allocation7 + $0x138] sm:$0xff] }
 0x165   : > { %v443_v19 = vpop.f32.mrb[0].mxu0 }
 0x166   : > { %v444_v20 = vadd.f32 %v443_v19, %v366_v17  ;;  %v445_v21 = vpop.f32.mrb[1].mxu0  ;;  %v1742_v17 = vpack.c.bf16 %v689_v11, %v684_v10  ;;  %v697_v19 = vld [vmem:[#allocation7 + $0x80] sm:$0xff]  ;;  %v728_v10 = vld [vmem:[#allocation7 + $0x178] sm:$0xff] }
 0x167   : > { %v446_v22 = vadd.f32 %v445_v21, %v370_v18  ;;  %v692_v18 = vld [vmem:[#allocation7 + $0x58] sm:$0xff]  ;;  %v1760_v11 = vpack.c.bf16 %v728_v10, %v723_v9 }
 0x168   : > { %v696_v21 = vld [vmem:[#allocation7 + $0x78] sm:$0xff] }
 0x169   : > { %1948 = vtanh.f32 %v446_v22  ;;  %v1714_v22 = vpack.c.bf16 %v697_v19, %v692_v18  ;;  %v731_v19 = vld [vmem:[#allocation7 + $0x190] sm:$0xff]  ;;  %v740_v10 = vld [vmem:[#allocation7 + $0x1d8] sm:$0xff] }
 0x16a   : > { %1950 = vtanh.f32 %v444_v20  ;;  %v691_v20 = vld [vmem:[#allocation7 + $0x50] sm:$0xff] }
 0x173   : > { %v1949_v23 = vpop.eup %1948 }
 0x174   : > { %v1951_v24 = vpop.eup %1950  ;;  %520 = vmatprep.mubr.f32.mxu1 %v1949_v23  ;;  %v1716_v23 = vpack.c.bf16 %v696_v21, %v691_v20  ;;  %v736_v20 = vld [vmem:[#allocation7 + $0x1b8] sm:$0xff]  ;;  %v734_v21 = vld [vmem:[#allocation7 + $0x1a8] sm:$0xff] }
 0x175   : > { %521 = vmatmul.mubr.f32.vlgmr.msra.gmra.mrb[0].mxu1 %v1951_v24  ;;  %v702_v24 = vld [vmem:[#allocation7 + $0xa8] sm:$0xff] }
 0x176   : > { %1584 = vmatprep.mubr.msk.f32.mxu1 %vm2164_vm1, %v2162_v0  ;;  %1688 = vmatpush3.bf16.msra.mxu1 %v1687_v40  ;;  %v1718_v26 = vpack.c.bf16 %v707_v25, %v702_v24  ;;  %v726_v40 = vld [vmem:[#allocation7 + $0x168] sm:$0xff]  ;;  %v733_v24 = vld [vmem:[#allocation7 + $0x1a0] sm:$0xff] }
 0x177   : > { %1689 = vmatprep.subr.bf16.mxu1 %v2163_v2  ;;  %v1728_v41 = vpack.c.bf16 %v726_v40, %v721_v38  ;;  %v738_v25 = vld [vmem:[#allocation7 + $0x1c8] sm:$0xff]  ;;  %v752_v40 = vld [vmem:[#allocation7 + $0x238] sm:$0xff] }
 0x178   : > { %v1764_v27 = vpack.c.bf16 %v738_v25, %v733_v24  ;;  %v1051_v24 = vld [vmem:[#allocation8 + $0x180] sm:$0xff] }
 0x17a   : > { %1691 = vmatpush3.bf16.msra.mxu1 %v1690_v42  ;;  %v1355_v42 = vld [vmem:[%s2523_s4 + $0x3] ss:$0 sm:$0xff] }
 0x17b   : > { %1692 = vmatprep.subr.bf16.mxu1 %v2163_v2 }
 0x17e   : > { %1694 = vmatpush3.bf16.msra.mxu1 %v1693_v45 }
 0x17f   : > { %1695 = vmatprep.subr.bf16.mxu1 %v2163_v2 }
 0x182   : > { %1697 = vmatpush3.bf16.msra.mxu1 %v1696_v48  ;;  %v694_v48 = vld [vmem:[#allocation7 + $0x68] sm:$0xff] }
 0x183   : > { %1698 = vmatprep.subr.bf16.mxu1 %v2163_v2 }
 0x186   : > { %1700 = vmatpush3.bf16.msra.mxu1 %v1699_v51  ;;  %v1746_v51 = vpack.c.bf16 %v699_v49, %v694_v48  ;;  %v753_v49 = vld [vmem:[#allocation7 + $0x240] sm:$0xff] }
 0x187   : > { %1701 = vmatprep.subr.bf16.mxu1 %v2163_v2 }
 0x18a   : > { %1703 = vmatpush3.bf16.msra.mxu1 %v1702_v60  ;;  %v708_v60 = vld [vmem:[#allocation7 + $0xd8] sm:$0xff] }
 0x18b   : > { %1704 = vmatprep.subr.bf16.mxu1 %v2163_v2 }
 0x18e   : > { %1706 = vmatpush3.bf16.msra.mxu1 %v1705_v63  ;;  %v1752_v63 = vpack.c.bf16 %v708_v60, %v703_v59  ;;  %v695_v59 = vld [vmem:[#allocation7 + $0x70] sm:$0xff]  ;;  %v700_v60 = vld [vmem:[#allocation7 + $0x98] sm:$0xff] }
 0x18f   : > { %1707 = vmatprep.subr.bf16.mxu1 %v2163_v2  ;;  %v1778_v62 = vpack.c.bf16 %v700_v60, %v695_v59 }
 0x192   : > { %1709 = vmatpush3.bf16.msra.mxu1 %v1708_v4  ;;  %v718_v4 = vld [vmem:[#allocation7 + $0x128] sm:$0xff] }
 0x193   : > { %1743 = vmatprep.subr.bf16.mxu1 %v1742_v17  ;;  %v1756_v7 = vpack.c.bf16 %v718_v4, %v713_v3  ;;  %v737_v17 = vld [vmem:[#allocation7 + $0x1c0] sm:$0xff]  ;;  %v715_v4 = vld [vmem:[#allocation7 + $0x110] sm:$0xff] }
 0x194   : > { %v1784_v6 = vpack.c.bf16 %v720_v5, %v715_v4  ;;  %v1042_v4 = vld [vmem:[#allocation8 + $0x138] sm:$0xff]  ;;  %v1027_v5 = vld [vmem:[#allocation8 + $0xc0] sm:$0xff] }
 0x248   : > { %v1393_v52 = vpop.f32.mrb[0].mxu1 }
 0x249   : > { %v1394_v54 = vpop.f32.mrb[1].mxu1 }
 0x24a   : > { %v1395_v55 = vadd.f32 %v1394_v54, %v1393_v52  ;;  %v693_v52 = vld [vmem:[#allocation7 + $0x60] sm:$0xff] }
 0x24c   : > { %v523_v56 = vadd.f32 %v1395_v55, %v1354_v53  ;;  %v698_v53 = vld [vmem:[#allocation7 + $0x88] sm:$0xff]  ;;  %v704_v55 = vld [vmem:[#allocation7 + $0xb8] sm:$0xff] }
 0x24e   : > { %1952 = vtanh.f32 %v523_v56  ;;  %v709_v56 = vld [vmem:[#allocation7 + $0xe0] sm:$0xff] }
 0x24f   : > { %v1750_v58 = vpack.c.bf16 %v709_v56, %v704_v55  ;;  %v685_v56 = vld [vmem:[#allocation7 + $0x20] sm:$0xff] }
 0x258   : > { %v1953_v57 = vpop.eup %1952 }
 0x259   : > { %1550 = vmatmul.mubr.f32.vlgmr.msra.gmra.mrb[2].mxu0 %v1953_v57  ;;  %v1748_v57 = vpack.c.bf16 %v698_v53, %v693_v52  ;;  %v1356_v52 = vld [vmem:[%s2523_s4 + $0x4] ss:$0 sm:$0xff] }
 0x25a   : > { %851 = vmatprep.mubr.f32.mxu0 %v2162_v0  ;;  %1713 = vmatpush1.bf16.msra.mxu0 %v1712_v15  ;;  %v732_v15 = vld [vmem:[#allocation7 + $0x198] sm:$0xff] }
 0x25b   : > { %1715 = vmatprep.subr.bf16.mxu0 %v1714_v22  ;;  %v1730_v18 = vpack.c.bf16 %v737_v17, %v732_v15  ;;  %v1732_v22 = vpack.c.bf16 %v736_v20, %v731_v19  ;;  %v745_v15 = vld [vmem:[#allocation7 + $0x200] sm:$0xff]  ;;  %v750_v17 = vld [vmem:[#allocation7 + $0x228] sm:$0xff]  ;;  %v755_v19 = vld [vmem:[#allocation7 + $0x250] sm:$0xff] }
 0x25c   : > { %v760_v20 = vld [vmem:[#allocation7 + $0x278] sm:$0xff] }
 0x25e   : > { %1717 = vmatpush1.bf16.msra.mxu0 %v1716_v23  ;;  %v739_v23 = vld [vmem:[#allocation7 + $0x1d0] sm:$0xff] }
 0x25f   : > { %1719 = vmatprep.subr.bf16.mxu0 %v1718_v26  ;;  %v1762_v26 = vpack.c.bf16 %v739_v23, %v734_v21  ;;  %v1796_v21 = vpack.c.bf16 %v760_v20, %v755_v19  ;;  %v1020_v23 = vld [vmem:[#allocation8 + $0x88] sm:$0xff]  ;;  %v1029_v20 = vld [vmem:[#allocation8 + $0xd0] sm:$0xff] }
 0x260   : > { %v1044_v19 = vld [vmem:[#allocation8 + $0x148] sm:$0xff] }
 0x262   : > { %1721 = vmatpush1.bf16.msra.mxu0 %v1720_v29  ;;  %v747_v29 = vld [vmem:[#allocation7 + $0x210] sm:$0xff] }
 0x263   : > { %1723 = vmatprep.subr.bf16.mxu0 %v1722_v33  ;;  %v1734_v30 = vpack.c.bf16 %v747_v29, %v742_v28  ;;  %v744_v33 = vld [vmem:[#allocation7 + $0x1f8] sm:$0xff]  ;;  %v1004_v28 = vld [vmem:[#allocation8 + $0x8] sm:$0xff] }
 0x266   : > { %1725 = vmatpush1.bf16.msra.mxu0 %v1724_v35  ;;  %v749_v35 = vld [vmem:[#allocation7 + $0x220] sm:$0xff] }
 0x267   : > { %1727 = vmatprep.subr.bf16.mxu0 %v1726_v39  ;;  %v1766_v38 = vpack.c.bf16 %v749_v35, %v744_v33  ;;  %v1768_v39 = vpack.c.bf16 %v748_v37, %v743_v36  ;;  %v1021_v33 = vld [vmem:[#allocation8 + $0x90] sm:$0xff]  ;;  %v1022_v35 = vld [vmem:[#allocation8 + $0x98] sm:$0xff] }
 0x268   : > { %v1053_v36 = vld [vmem:[#allocation8 + $0x190] sm:$0xff]  ;;  %v1054_v37 = vld [vmem:[#allocation8 + $0x198] sm:$0xff] }
 0x26a   : > { %1729 = vmatpush1.bf16.msra.mxu0 %v1728_v41  ;;  %v757_v41 = vld [vmem:[#allocation7 + $0x260] sm:$0xff] }
 0x26b   : > { %1731 = vmatprep.subr.bf16.mxu0 %v1730_v18  ;;  %v1793_v18 = vpack.c.bf16 %v750_v17, %v745_v15  ;;  %v1012_v15 = vld [vmem:[#allocation8 + $0x48] sm:$0xff]  ;;  %v1043_v17 = vld [vmem:[#allocation8 + $0x140] sm:$0xff] }
 0x26e   : > { %1733 = vmatpush1.bf16.msra.mxu0 %v1732_v22  ;;  %v1019_v22 = vld [vmem:[#allocation8 + $0x80] sm:$0xff] }
 0x26f   : > { %1735 = vmatprep.subr.bf16.mxu0 %v1734_v30  ;;  %v1798_v25 = vpack.c.bf16 %v1020_v23, %v1019_v22  ;;  %v1061_v22 = vld [vmem:[#allocation8 + $0x1d0] sm:$0xff]  ;;  %v1062_v23 = vld [vmem:[#allocation8 + $0x1d8] sm:$0xff] }
 0x272   : > { %1737 = vmatpush1.bf16.msra.mxu0 %v1736_v34  ;;  %v1832_v34 = vpack.c.bf16 %v1036_v32, %v1035_v31  ;;  %v1046_v31 = vld [vmem:[#allocation8 + $0x158] sm:$0xff]  ;;  %v1031_v32 = vld [vmem:[#allocation8 + $0xe0] sm:$0xff] }
 0x32c   : > { %v599_v43 = vpop.f32.mrb[2].mxu0 }
 0x32d   : > { %v600_v44 = vadd.f32 %v1355_v42, %v599_v43  ;;  %v1551_v45 = vpop.f32.mrb[3].mxu0  ;;  %v751_v42 = vld [vmem:[#allocation7 + $0x230] sm:$0xff]  ;;  %v1738_v43 = vpack.c.bf16 %v757_v41, %v752_v40  ;;  %v1006_v40 = vld [vmem:[#allocation8 + $0x18] sm:$0xff] }
 0x32e   : > { %v754_v45 = vld [vmem:[#allocation7 + $0x248] sm:$0xff]  ;;  %v1037_v41 = vld [vmem:[#allocation8 + $0x110] sm:$0xff] }
 0x32f   : > { %1954 = vtanh.f32 %v600_v44  ;;  %v756_v44 = vld [vmem:[#allocation7 + $0x258] sm:$0xff]  ;;  %v1770_v48 = vpack.c.bf16 %v759_v46, %v754_v45  ;;  %1739 = vmatprep.subr.bf16.mxu0 %v1738_v43  ;;  %v1024_v45 = vld [vmem:[#allocation8 + $0xa8] sm:$0xff] }
 0x330   : > { %v1740_v47 = vpack.c.bf16 %v756_v44, %v751_v42  ;;  %v1038_v43 = vld [vmem:[#allocation8 + $0x118] sm:$0xff]  ;;  %v1023_v44 = vld [vmem:[#allocation8 + $0xa0] sm:$0xff] }
 0x331   : > { %v1836_v46 = vpack.c.bf16 %v1038_v43, %v1037_v41  ;;  %v1047_v41 = vld [vmem:[#allocation8 + $0x160] sm:$0xff] }
 0x332   : > { %1741 = vmatpush1.bf16.msra.mxu0 %v1740_v47  ;;  %v1806_v47 = vpack.c.bf16 %v1024_v45, %v1023_v44  ;;  %v1033_v45 = vld [vmem:[#allocation8 + $0xf0] sm:$0xff] }
 0x333   : > { %1774 = vmatprep.subr.bf16.mxu0 %v2163_v2 }
 0x339   : > { %v1955_v54 = vpop.eup %1954 }
 0x33a   : > { %1585 = vmatmul.mubr.f32.vlgmr.msra.gmra.mrb[2].mxu1 %v1955_v54 }
 0x33b   : > { %1745 = vmatpush1.bf16.msra.mxu1 %v1744_v50  ;;  %922 = vmatprep.mubr.f32.mxu1 %v2162_v0  ;;  %v758_v50 = vld [vmem:[#allocation7 + $0x268] sm:$0xff] }
 0x33c   : > { %1747 = vmatprep.subr.bf16.mxu1 %v1746_v51  ;;  %v1772_v51 = vpack.c.bf16 %v758_v50, %v753_v49  ;;  %v1056_v49 = vld [vmem:[#allocation8 + $0x1a8] sm:$0xff]  ;;  %v1007_v50 = vld [vmem:[#allocation8 + $0x20] sm:$0xff] }
 0x33f   : > { %1749 = vmatpush1.bf16.msra.mxu1 %v1748_v57  ;;  %v690_v57 = vld [vmem:[#allocation7 + $0x48] sm:$0xff] }
 0x340   : > { %1751 = vmatprep.subr.bf16.mxu1 %v1750_v58  ;;  %v1775_v58 = vpack.c.bf16 %v690_v57, %v685_v56  ;;  %v1025_v56 = vld [vmem:[#allocation8 + $0xb0] sm:$0xff]  ;;  %v1026_v57 = vld [vmem:[#allocation8 + $0xb8] sm:$0xff] }
 0x341   : > { %v1810_v60 = vpack.c.bf16 %v1026_v57, %v1025_v56 }
 0x343   : > { %1753 = vmatpush1.bf16.msra.mxu1 %v1752_v63  ;;  %v705_v63 = vld [vmem:[#allocation7 + $0xc0] sm:$0xff] }
 0x344   : > { %1755 = vmatprep.subr.bf16.mxu1 %v1754_v1  ;;  %v710_v1 = vld [vmem:[#allocation7 + $0xe8] sm:$0xff] }
 0x345   : > { %v1781_v3 = vpack.c.bf16 %v710_v1, %v705_v63  ;;  %v1010_v63 = vld [vmem:[#allocation8 + $0x38] sm:$0xff] }
 0x347   : > { %1757 = vmatpush1.bf16.msra.mxu1 %v1756_v7  ;;  %v725_v7 = vld [vmem:[#allocation7 + $0x160] sm:$0xff] }
 0x348   : > { %1759 = vmatprep.subr.bf16.mxu1 %v1758_v8  ;;  %v730_v8 = vld [vmem:[#allocation7 + $0x188] sm:$0xff] }
 0x349   : > { %v1787_v9 = vpack.c.bf16 %v730_v8, %v725_v7  ;;  %v1059_v7 = vld [vmem:[#allocation8 + $0x1c0] sm:$0xff]  ;;  %v1060_v8 = vld [vmem:[#allocation8 + $0x1c8] sm:$0xff] }
 0x34b   : > { %1761 = vmatpush1.bf16.msra.mxu1 %v1760_v11 }
 0x34c   : > { %1763 = vmatprep.subr.bf16.mxu1 %v1762_v26  ;;  %v1052_v26 = vld [vmem:[#allocation8 + $0x188] sm:$0xff] }
 0x34d   : > { %v1830_v29 = vpack.c.bf16 %v1052_v26, %v1051_v24 }
 0x34f   : > { %1765 = vmatpush1.bf16.msra.mxu1 %v1764_v27  ;;  %v1003_v27 = vld [vmem:[#allocation8] sm:$0xff] }
 0x350   : > { %1767 = vmatprep.subr.bf16.mxu1 %v1766_v38  ;;  %v1800_v30 = vpack.c.bf16 %v1004_v28, %v1003_v27  ;;  %v1834_v38 = vpack.c.bf16 %v1054_v37, %v1053_v36  ;;  %v1013_v27 = vld [vmem:[#allocation8 + $0x50] sm:$0xff]  ;;  %v1014_v28 = vld [vmem:[#allocation8 + $0x58] sm:$0xff] }
 0x351   : > { %v1820_v36 = vpack.c.bf16 %v1014_v28, %v1013_v27 }
 0x353   : > { %1769 = vmatpush1.bf16.msra.mxu1 %v1768_v39  ;;  %v1005_v39 = vld [vmem:[#allocation8 + $0x10] sm:$0xff] }
 0x354   : > { %1771 = vmatprep.subr.bf16.mxu1 %v1770_v48  ;;  %v1804_v42 = vpack.c.bf16 %v1006_v40, %v1005_v39  ;;  %v1055_v48 = vld [vmem:[#allocation8 + $0x1a0] sm:$0xff]  ;;  %v1016_v39 = vld [vmem:[#allocation8 + $0x68] sm:$0xff] }
 0x357   : > { %1773 = vmatpush1.bf16.msra.mxu1 %v1772_v51  ;;  %v1838_v51 = vpack.c.bf16 %v1056_v49, %v1055_v48  ;;  %v1066_v49 = vld [vmem:[#allocation8 + $0x1f8] sm:$0xff] }
 0x358   : > { %1799 = vmatprep.subr.bf16.mxu1 %v1798_v25  ;;  %v1848_v25 = vpack.c.bf16 %v1044_v19, %v1043_v17 }
 0x40d   : > { %v676_v53 = vpop.f32.mrb[2].mxu1 }
 0x40e   : > { %v677_v54 = vadd.f32 %v1356_v52, %v676_v53  ;;  %v1586_v55 = vpop.f32.mrb[3].mxu1  ;;  %v1008_v52 = vld [vmem:[#allocation8 + $0x28] sm:$0xff]  ;;  %v1039_v53 = vld [vmem:[#allocation8 + $0x120] sm:$0xff] }
 0x40f   : > { %v1808_v55 = vpack.c.bf16 %v1008_v52, %v1007_v50  ;;  %v1017_v50 = vld [vmem:[#allocation8 + $0x70] sm:$0xff] }
 0x410   : > { %1956 = vtanh.f32 %v677_v54  ;;  %v1040_v54 = vld [vmem:[#allocation8 + $0x128] sm:$0xff] }
 0x411   : > { %v1840_v59 = vpack.c.bf16 %v1040_v54, %v1039_v53  ;;  %v1049_v54 = vld [vmem:[#allocation8 + $0x170] sm:$0xff] }
 0x41a   : > { %v1957_v61 = vpop.eup %1956 }
 0x41b   : > { %852 = vmatmul.mubr.f32.vlgmr.msra.gmra.mrb[4].mxu0 %v1957_v61  ;;  %923 = vmatmul.mubr.f32.vlgmr.msra.gmra.mrb[4].mxu1 %v1957_v61 }
 0x41c   : > { %1776 = vmatpush3.bf16.msra.mxu0 %v1775_v58  ;;  %1619 = vmatprep.mubr.msk.f32.mxu0 %vm2164_vm1, %v2162_v0  ;;  %v735_v0 = vld [vmem:[#allocation7 + $0x1b0] sm:$0xff] }
 0x41d   : > { %1777 = vmatprep.subr.bf16.mxu0 %v2163_v2  ;;  %v1790_v11 = vpack.c.bf16 %v740_v10, %v735_v0  ;;  %1801 = vmatpush3.bf16.msra.mxu1 %v1800_v30  ;;  %v1057_v58 = vld [vmem:[#allocation8 + $0x1b0] sm:$0xff]  ;;  %v1850_v30 = vpack.c.bf16 %v1062_v23, %v1061_v22 }
 0x420   : > { %1779 = vmatpush3.bf16.msra.mxu0 %v1778_v62  ;;  %v1009_v62 = vld [vmem:[#allocation8 + $0x30] sm:$0xff] }
 0x421   : > { %1780 = vmatprep.subr.bf16.mxu0 %v2163_v2 }
 0x424   : > { %1782 = vmatpush3.bf16.msra.mxu0 %v1781_v3  ;;  %v1041_v3 = vld [vmem:[#allocation8 + $0x130] sm:$0xff] }
 0x425   : > { %1783 = vmatprep.subr.bf16.mxu0 %v2163_v2  ;;  %v1844_v0 = vpack.c.bf16 %v1042_v4, %v1041_v3 }
 0x428   : > { %1785 = vmatpush3.bf16.msra.mxu0 %v1784_v6  ;;  %v1028_v6 = vld [vmem:[#allocation8 + $0xc8] sm:$0xff] }
 0x429   : > { %1786 = vmatprep.subr.bf16.mxu0 %v2163_v2  ;;  %v1814_v10 = vpack.c.bf16 %v1028_v6, %v1027_v5 }
 0x42c   : > { %1788 = vmatpush3.bf16.msra.mxu0 %v1787_v9  ;;  %v1812_v9 = vpack.c.bf16 %v1010_v63, %v1009_v62  ;;  %v772_v62 = vsub.s32 2, %v2412_v13  ;;  %v776_v63 = vsub.s32 3, %v2412_v13 }
 0x42d   : > { %1789 = vmatprep.subr.bf16.mxu0 %v2163_v2 }
 0x430   : > { %1791 = vmatpush3.bf16.msra.mxu0 %v1790_v11  ;;  %v1011_v11 = vld [vmem:[#allocation8 + $0x40] sm:$0xff] }
 0x431   : > { %1792 = vmatprep.subr.bf16.mxu0 %v2163_v2  ;;  %v1816_v24 = vpack.c.bf16 %v1012_v15, %v1011_v11 }
 0x434   : > { %1794 = vmatpush3.bf16.msra.mxu0 %v1793_v18  ;;  %v1846_v18 = vpack.c.bf16 %v1060_v8, %v1059_v7 }
 0x435   : > { %1795 = vmatprep.subr.bf16.mxu0 %v2163_v2  ;;  %v1802_v2 = vpack.c.bf16 %v1022_v35, %v1021_v33  ;;  %v1032_v33 = vld [vmem:[#allocation8 + $0xe8] sm:$0xff] }
 0x436   : > { %v1064_v35 = vld [vmem:[#allocation8 + $0x1e8] sm:$0xff] }
 0x437   : > { %1803 = vmatprep.subr.bf16.mxu1 %v1802_v2  ;;  %v1822_v2 = vpack.c.bf16 %v1032_v33, %v1031_v32  ;;  %v1208_v32 = vand.u32 127, %v363_v12 }
 0x438   : > { %1797 = vmatpush3.bf16.msra.mxu0 %v1796_v21  ;;  %1805 = vmatpush3.bf16.msra.mxu1 %v1804_v42  ;;  %v1030_v21 = vld [vmem:[#allocation8 + $0xd8] sm:$0xff]  ;;  %v1048_v42 = vld [vmem:[#allocation8 + $0x168] sm:$0xff] }
 0x439   : > { %1831 = vmatprep.subr.bf16.mxu0 %v1830_v29  ;;  %1807 = vmatprep.subr.bf16.mxu1 %v1806_v47  ;;  %v1818_v26 = vpack.c.bf16 %v1030_v21, %v1029_v20  ;;  %v1045_v29 = vld [vmem:[#allocation8 + $0x150] sm:$0xff]  ;;  %v1856_v44 = vpack.c.bf16 %v1048_v42, %v1047_v41  ;;  %vm1209_vm2 = vcmp.eq.s32.totalorder %v1208_v32, 0 }
 0x43a   : > { %v1852_v37 = vpack.c.bf16 %v1046_v31, %v1045_v29  ;;  %v1065_v47 = vld [vmem:[#allocation8 + $0x1f0] sm:$0xff] }
 0x43b   : > { %1620 = vmatmul.mubr.f32.vlgmr.msra.gmra.mrb[6].mxu0 %v1957_v61  ;;  %v1058_v61 = vld [vmem:[#allocation8 + $0x1b8] sm:$0xff]  ;;  %v1858_v52 = vpack.c.bf16 %v1066_v49, %v1065_v47 }
 0x43c   : > { %1833 = vmatpush3.bf16.msra.mxu0 %v1832_v34  ;;  %v1842_v1 = vpack.c.bf16 %v1058_v61, %v1057_v58  ;;  %1809 = vmatpush3.bf16.msra.mxu1 %v1808_v55  ;;  %v1063_v34 = vld [vmem:[#allocation8 + $0x1e0] sm:$0xff]  ;;  %v1050_v55 = vld [vmem:[#allocation8 + $0x178] sm:$0xff] }
 0x43d   : > { %1835 = vmatprep.subr.bf16.mxu0 %v1834_v38  ;;  %1811 = vmatprep.subr.bf16.mxu1 %v1810_v60  ;;  %v1015_v38 = vld [vmem:[#allocation8 + $0x60] sm:$0xff]  ;;  %v1854_v40 = vpack.c.bf16 %v1064_v35, %v1063_v34  ;;  %v1860_v56 = vpack.c.bf16 %v1050_v55, %v1049_v54  ;;  %v361_v61 = vld [vmem:[%s2523_s4 + $0x5] sm:$0x1f] }
 0x43e   : > { %v1824_v43 = vpack.c.bf16 %v1016_v39, %v1015_v38  ;;  %v765_v3 = vrot.slane %v361_v61, %v365_v14  ;;  %v773_v4 = vrot.slane %v361_v61, %v772_v62  ;;  %v769_v5 = vrot.slane %v361_v61, %v369_v16 }
 0x43f   : > { %v777_v6 = vrot.slane %v361_v61, %v776_v63 }
 0x440   : > { %1837 = vmatpush3.bf16.msra.mxu0 %v1836_v46  ;;  %1813 = vmatpush3.bf16.msra.mxu1 %v1812_v9  ;;  %v1034_v46 = vld [vmem:[#allocation8 + $0xf8] sm:$0xff] }
 0x441   : > { %1839 = vmatprep.subr.bf16.mxu0 %v1838_v51  ;;  %1815 = vmatprep.subr.bf16.mxu1 %v1814_v10  ;;  %v1826_v48 = vpack.c.bf16 %v1034_v46, %v1033_v45  ;;  %v1018_v51 = vld [vmem:[#allocation8 + $0x78] sm:$0xff] }
 0x442   : > { %v1828_v53 = vpack.c.bf16 %v1018_v51, %v1017_v50 }
 0x444   : > { %1841 = vmatpush3.bf16.msra.mxu0 %v1840_v59  ;;  %1817 = vmatpush3.bf16.msra.mxu1 %v1816_v24 }
 0x445   : > { %1843 = vmatprep.subr.bf16.mxu0 %v1842_v1  ;;  %1819 = vmatprep.subr.bf16.mxu1 %v1818_v26  ;;  %v780_v1 = vsub.s32 4, %v2412_v13 }
 0x447   : > { %v781_v7 = vrot.slane %v361_v61, %v780_v1 }
 0x448   : > { %1845 = vmatpush3.bf16.msra.mxu0 %v1844_v0  ;;  %1821 = vmatpush3.bf16.msra.mxu1 %v1820_v36 }
 0x449   : > { %1847 = vmatprep.subr.bf16.mxu0 %v1846_v18  ;;  %1823 = vmatprep.subr.bf16.mxu1 %v1822_v2 }
 0x44c   : > { %1849 = vmatpush3.bf16.msra.mxu0 %v1848_v25  ;;  %1825 = vmatpush3.bf16.msra.mxu1 %v1824_v43 }
 0x44d   : > { %1851 = vmatprep.subr.bf16.mxu0 %v1850_v30  ;;  %1827 = vmatprep.subr.bf16.mxu1 %v1826_v48 }
 0x450   : > { %1853 = vmatpush3.bf16.msra.mxu0 %v1852_v37  ;;  %1829 = vmatpush3.bf16.msra.mxu1 %v1828_v53 }
 0x451   : > { %1855 = vmatprep.subr.bf16.mxu0 %v1854_v40 }
 0x454   : > { %1857 = vmatpush3.bf16.msra.mxu0 %v1856_v44 }
 0x455   : > { %1859 = vmatprep.subr.bf16.mxu0 %v1858_v52 }
 0x458   : > { %1861 = vmatpush3.bf16.msra.mxu0 %v1860_v56 }
 0x4ee   : > { %v853_v57 = vpop.f32.mrb[4].mxu0  ;;  %v924_v58 = vpop.f32.mrb[4].mxu1 }
 0x4ef   : > { %v855_v59 = vpop.f32.mrb[5].mxu0  ;;  %v926_v60 = vpop.f32.mrb[5].mxu1  ;;  %v854_v8 = vadd.f32 %v853_v57, %v765_v3  ;;  %v925_v0 = vadd.f32 %v924_v58, %v773_v4 }
 0x4f0   : > { %v856_v10 = vadd.f32 %v855_v59, %v769_v5  ;;  %v927_v11 = vadd.f32 %v926_v60, %v777_v6 }
 0x50e   : > { %v995_v9 = vpop.f32.mrb[6].mxu0 }
 0x50f   : > { %v996_v15 = vadd.f32 %v995_v9, %v781_v7  ;;  %v1621_v17 = vpop.f32.mrb[7].mxu0 }
 0x511   : > { %v1000_v18 = vmul.f32 %v996_v15, %v856_v10  ;;  %v1002_v19 = vmul.f32 %v996_v15, %v927_v11  ;;  %v999_v20 = vmul.f32 %v996_v15, %v854_v8  ;;  %v1001_v21 = vmul.f32 %v996_v15, %v925_v0 }
 0x513   : > { %1131 = vmatprep.mubr.f32.mxu1 %v1000_v18  ;;  %1201 = vmatprep.mubr.f32.mxu0 %v1002_v19 }
 0x514   : > { %1132 = vmatmul.mubr.f32.vlgmr.msra.gmra.mrb[6].mxu1 %v999_v20  ;;  %1202 = vmatmul.mubr.f32.vlgmr.msra.gmra.mrb[8].mxu0 %v1001_v21 }
 0x5e7   : > { %v1479_v14 = vpop.f32.mrb[6].mxu1  ;;  %v1514_v13 = vpop.f32.mrb[8].mxu0 }
 0x5e8   : > { %v1480_v16 = vpop.f32.mrb[7].mxu1  ;;  %v1515_v22 = vpop.f32.mrb[9].mxu0 }
 0x5e9   : > { %v1481_v23 = vadd.f32 %v1480_v16, %v1479_v14  ;;  %v1516_v24 = vadd.f32 %v1515_v22, %v1514_v13 }
 0x5eb   : > { %v1204_v25 = vadd.f32 %v1516_v24, %v1481_v23 }
 0x5ed   : > { %v1211_v26 = vmin.f32 %v1204_v25, 20.0  ;;  %vm1210_vm4 = vcmp.gt.f32.partialorder %v1204_v25, 20.0 }
 0x5ef   : > { %v1212_v27 = vmul.f32 1.442695, %v1211_v26 }
 0x5f1   : > { %1958 = vpow2.f32 %v1212_v27 }
 0x5fb   : > { %v1959_v28 = vpop.eup %1958 }
 0x5fc   : > { %v1214_v29 = vadd.f32 1.0, %v1959_v28  ;;  %v1217_v30 = vmul.f32 -0.5, %v1959_v28  ;;  %v1220_v33 = vand.u32 2147483647, %v1959_v28 }
 0x5fe   : > { %1960 = vlog2.f32 %v1214_v29  ;;  %v1218_v31 = vadd.f32 1.0, %v1217_v30  ;;  %vm1221_vm3 = vcmp.lt.f32.partialorder %v1220_v33, 0.0004427343 }
 0x600   : > { %v1219_v36 = vmul.f32 %v1959_v28, %v1218_v31 }
 0x608   : > { %v1961_v34 = vpop.eup %1960 }
 0x609   : > { %v1216_v35 = vmul.f32 0.6931472, %v1961_v34 }
 0x60b   : > { %v1222_v37 = vsel %vm1221_vm3, %v1219_v36, %v1216_v35 }
 0x60c   : > { %v1223_v2 = vsel %vm1210_vm4, %v1204_v25, %v1222_v37 }
 0x60d   : > { %v1224_v12 = vsel %vm1209_vm2, %v1204_v25, %v1223_v2 }
 0x60e   : > { %1225 = vst [vmem:[%s283_s13] sm:$0xff] %v1224_v12 }
 0x60f   : > { %2089 = shalt.err (!%p2086_p4)
}
 0x610   : > { %s2090_s14 = scalar_lea.hbm %s2475_s26, 128  ;;  %s2094_s27 = scalar_lea.hbm %s2524_s5, 256 }
 0x611   : > { %p2091_p0 = scmp.ne.s32.totalorder %s2475_s26, %s2090_s14  ;;  %p2095_p8 = scmp.lt.u32.totalorder %s2475_s26, %s2524_s5 }
 0x612   : > { %p2096_p13 = scmp.lt.u32.totalorder %s2094_s27, %s2090_s14  ;;  %p2098_p10 = scmp.lt.u32.totalorder %s2090_s14, %s2475_s26 }
 0x613   : > { %p2092_p9 = pnand %p2091_p0, %p2338_p5 }
 0x614   : > { %p2097_p6 = por %p2096_p13, %p2095_p8 }
 0x615   : > { %p2093_p11 = pneg %p2092_p9 }
 0x616   : > { %p2099_p3 = por %p2098_p10, %p2097_p6 }
 0x618   : > { %p2100_p7 = pnand %p2099_p3, %p2093_p11 }
 0x61a   : > { %2103 = shalt.err (!%p2100_p7)
}
 0x61b   : > { %1876 = dma.vmem_to_hbm [thread:$0]  (%p2338_p5), %s2477_s17, 128, %s2475_s26, %s1227_s22  }
 0x61c PF: > { %s1252_s10 = sand.u32 1, %s2138_s18   ;;  %p2542_p12 = scmp.ne.s32.totalorder %s2529_s25, 0 }
 0x61d   : > { %p2543_p2 = scmp.ge.s32.totalorder %s2150_s21, 2  ;;  %s1253_s13 = scalar_lea.sflag [#allocation4], %s1252_s10 }
 0x61f   : > { %p1893_p1 = pnand %p2543_p2, %p2542_p12 }
 0x621   : > { %2133 = dma.done.wait (!%p1893_p1), %s1253_s13, 128  }
 0x622   : > { %2135 = vsyncadd (!%p1893_p1), %s1253_s13, 4294967168  ;;  %p20_p4 = scmp.ge.s32.totalorder %s2324_s16, 4   ;;  %s2544_s18 = smov %s2142_s19 }
 0x623   : > { %s2545_s19 = smov %s2146_s20  ;;  %s2546_s20 = smov %s2334_s30 }
 0x624   : > { %s2547_s21 = smov %s2324_s16  ;;  %22 = sbr.rel (!%p20_p4) target bundleno = 7 (0x7), region = 97 }
 0x62b   :  { %1258 = vsyncpa [#allocation3], 1 }
 0x62c   :  { %1260 = vsyncpa [#allocation3 + $0x1], 1 }
 0x62d   :  { %1261 = vsyncpa [#allocation6], 1 }
 0x62e   :  { %1262 = vsyncpa [#allocation9], 1 }
 0x62f   :  { %1263 = vsyncpa [#allocation4], 1 }
 0x630   :  { %1265 = vsyncpa [#allocation4 + $0x1], 1 }

</bundles_post_ra>
